<compile_context>
chip_gen: v7x
topology: tpu7x:2x2x1
jax: 0.10.0
libtpu: 0.0.40
codegen_flags: <defaults>
</compile_context>

<pallas_src>
import jax
import jax.numpy as jnp
from jax.experimental import pallas as pl
from jax.experimental.pallas import tpu as pltpu

HIDDEN = 16      # fc1 out features
IN_F = 2         # fc1 in features
OUT_F = 2        # fc2 out features
LANE = 128       # TPU lane width
MAX_TS = 2048    # max rows-of-128 per block -> (2, 2048, 128) f32 = 2 MiB per buffer


def _cdiv(a, b):
    return -(-a // b)


def _round_up(n, m):
    return ((n + m - 1) // m) * m


def _choose_ts(nb):
    """Rows-of-128 per grid step.

    Aims for >=8 grid steps (megacore load balance on v7x) when there is enough
    work, keeps blocks <= ~2 MiB, and guarantees the row count is a multiple of
    8 (or the full extent for tiny inputs) so the (8,128) block rule holds and
    the in-kernel 64-row chunking divides evenly.
    """
    if nb <= 8:
        return nb                                   # single tiny block (== full dim)
    if nb <= 512:
        return max(8, _round_up(_cdiv(nb, 8), 8))   # ts in [8, 64], multiple of 8
    return min(MAX_TS, _round_up(_cdiv(nb, 8), 64))  # ts multiple of 64, capped


def simplenet_kernel(x_ref, w1_ref, b1_ref, w2_ref, b2_ref, o_ref):
    """x_ref / o_ref: (2, TS, 128) f32 VMEM blocks (feature, row-of-128, lane).

    w1_ref: (16, 2), b1_ref: (16,), w2_ref: (2, 16), b2_ref: (2,) -- all f32 in
    SMEM, PyTorch nn.Linear (out_features, in_features) layout, read as scalars.
    The whole MLP is unrolled scalar*slab VPU FMAs (no MXU: K=2 / N=2).
    """
    ts = x_ref.shape[1]
    hid = w1_ref.shape[0]
    # Sub-chunk the rows so the live set (x0, x1, acc0, acc1, h) stays ~40 vregs
    # instead of whole-block arrays (prevents f32 spills when TS is large).
    ch = ts if ts <= 64 else 64          # ts > 64 is always a multiple of 64
    n_chunks = ts // ch

    # Hoist every SMEM scalar read (and its splat) out of the chunk loop.
    w1a = [w1_ref[j, 0] for j in range(hid)]
    w1b = [w1_ref[j, 1] for j in range(hid)]
    b1v = [b1_ref[j] for j in range(hid)]
    w2a = [w2_ref[0, j] for j in range(hid)]
    w2b = [w2_ref[1, j] for j in range(hid)]
    b2a = b2_ref[0]
    b2b = b2_ref[1]

    def chunk(r):
        x0 = x_ref[0, pl.ds(r, ch), :]              # (ch, 128) feature-0 slab
        x1 = x_ref[1, pl.ds(r, ch), :]              # (ch, 128) feature-1 slab
        acc0 = jnp.full_like(x0, b2a)               # fc2 bias folded into init
        acc1 = jnp.full_like(x0, b2b)
        for j in range(hid):                        # static unroll: pure VPU FMAs
            h = jnp.maximum(w1a[j] * x0 + w1b[j] * x1 + b1v[j], 0.0)
            acc0 = acc0 + w2a[j] * h
            acc1 = acc1 + w2b[j] * h
        o_ref[0, pl.ds(r, ch), :] = acc0            # lane-dense, full-sublane stores
        o_ref[1, pl.ds(r, ch), :] = acc1

    if n_chunks == 1:
        chunk(0)
    else:
        @pl.loop(0, n_chunks)
        def _(c):
            chunk(pl.multiple_of(c * ch, ch))


@jax.jit
def simplenet_forward(x, w1, b1, w2, b2):
    """x: (B, 2) f32.  w1: (16, 2), b1: (16,), w2: (2, 16), b2: (2,) in PyTorch
    nn.Linear layouts (no pre-transposition needed).  Returns (B, 2) f32."""
    B = x.shape[0]

    nb = _cdiv(B, LANE)
    ts = _choose_ts(nb)
    Bp = _round_up(B, LANE)          # pad only to the lane boundary (for the reshape)
    nB = Bp // LANE
    grid = _cdiv(nB, ts)             # ragged tail handled by Pallas partial blocks

    # Lane flip: put batch on the 128-lane axis.  This transpose (+ small pad)
    # is the one unavoidable layout copy for the (B, 2) external API.
    xt = x.T                                               # (2, B)
    if Bp != B:
        xt = jnp.pad(xt, ((0, 0), (0, Bp - B)))            # fuses with the transpose
    x3 = xt.reshape(IN_F, nB, LANE)                        # free (metadata-only)

    smem = pl.BlockSpec(memory_space=pltpu.MemorySpace.SMEM)

    out = pl.pallas_call(
        simplenet_kernel,
        out_shape=jax.ShapeDtypeStruct((OUT_F, nB, LANE), jnp.float32),
        grid=(grid,),
        in_specs=[
            pl.BlockSpec((IN_F, ts, LANE), lambda i: (0, i, 0)),  # lane-dense x tile
            smem,    # w1 (16, 2): SMEM-resident, scalar reads
            smem,    # b1 (16,)
            smem,    # w2 (2, 16)
            smem,    # b2 (2,)
        ],
        out_specs=pl.BlockSpec((OUT_F, ts, LANE), lambda i: (0, i, 0)),
        compiler_params=pltpu.CompilerParams(
            dimension_semantics=("parallel",)),   # shard batch tiles over TCs (v7x)
    )(x3, w1, b1, w2, b2)

    # Padded lanes (garbage = relu(b1)@w2.T + b2) are sliced off before return.
    return out.reshape(OUT_F, Bp)[:, :B].T                 # back to (B, 2)


def init_params(key):
    """Deterministic init mimicking nn.Linear shapes / uniform(+-1/sqrt(fan_in))."""
    k1, k2, k3, k4 = jax.random.split(key, 4)
    lim1 = 1.0 / jnp.sqrt(2.0)
    lim2 = 1.0 / jnp.sqrt(16.0)
    w1 = jax.random.uniform(k1, (HIDDEN, IN_F), jnp.float32, -lim1, lim1)   # fc1.weight
    b1 = jax.random.uniform(k2, (HIDDEN,), jnp.float32, -lim1, lim1)        # fc1.bias
    w2 = jax.random.uniform(k3, (OUT_F, HIDDEN), jnp.float32, -lim2, lim2)  # fc2.weight
    b2 = jax.random.uniform(k4, (OUT_F,), jnp.float32, -lim2, lim2)         # fc2.bias
    return w1, b1, w2, b2


def _reference(x, w1, b1, w2, b2):
    return jnp.maximum(x @ w1.T + b1, 0.0) @ w2.T + b2


if __name__ == "__main__":
    key = jax.random.PRNGKey(0)
    kx, kx2, kp = jax.random.split(key, 3)
    w1, b1, w2, b2 = init_params(kp)

    # Small primary case (as the module implies: batch of (B, 2) inputs).
    B = 8
    x = jax.random.normal(kx, (B, IN_F), dtype=jnp.float32)
    out = simplenet_forward(x, w1, b1, w2, b2)
    jax.block_until_ready(out)
    ref = _reference(x, w1, b1, w2, b2)
    assert out.shape == (B, OUT_F)
    assert jnp.allclose(out, ref, atol=1e-5, rtol=1e-5)

    # Second case exercising the multi-step grid + lane padding + slice-off path.
    B2 = 2000
    x2 = jax.random.normal(kx2, (B2, IN_F), dtype=jnp.float32)
    out2 = simplenet_forward(x2, w1, b1, w2, b2)
    jax.block_until_ready(out2)
    ref2 = _reference(x2, w1, b1, w2, b2)
    assert out2.shape == (B2, OUT_F)
    assert jnp.allclose(out2, ref2, atol=1e-5, rtol=1e-5)

    print("KERNEL_OK")
</pallas_src>

<mosaic_0001>
module attributes {stable_mosaic.version = 11 : i64} {
  func.func @simplenet_kernel(%arg0: i32, %arg1: memref<2x1x128xf32, #tpu.memory_space<vmem>>, %arg2: memref<16x2xf32, #tpu.memory_space<smem>>, %arg3: memref<16xf32, #tpu.memory_space<smem>>, %arg4: memref<2x16xf32, #tpu.memory_space<smem>>, %arg5: memref<2xf32, #tpu.memory_space<smem>>, %arg6: memref<2x1x128xf32, #tpu.memory_space<vmem>>) attributes {dimension_semantics = [#tpu.dimension_semantics<parallel>], iteration_bounds = array<i64: 1>, scalar_prefetch = 0 : i64, scratch_operands = 0 : i64, tpu.core_type = #tpu.core_type<tc>, window_params = [{transform_indices = @transform_0, window_bounds = array<i64: 2, 1, 128>}, {transform_indices = @transform_1, window_bounds = array<i64: 16, 2>}, {transform_indices = @transform_2, window_bounds = array<i64: 16>}, {transform_indices = @transform_3, window_bounds = array<i64: 2, 16>}, {transform_indices = @transform_4, window_bounds = array<i64: 2>}, {transform_indices = @transform_5, window_bounds = array<i64: 2, 1, 128>}]} {
    %c0 = arith.constant 0 : index
    %c0_0 = arith.constant 0 : index
    %0 = memref.load %arg2[%c0, %c0_0] : memref<16x2xf32, #tpu.memory_space<smem>>
    %c1 = arith.constant 1 : index
    %c0_1 = arith.constant 0 : index
    %1 = memref.load %arg2[%c1, %c0_1] : memref<16x2xf32, #tpu.memory_space<smem>>
    %c2 = arith.constant 2 : index
    %c0_2 = arith.constant 0 : index
    %2 = memref.load %arg2[%c2, %c0_2] : memref<16x2xf32, #tpu.memory_space<smem>>
    %c3 = arith.constant 3 : index
    %c0_3 = arith.constant 0 : index
    %3 = memref.load %arg2[%c3, %c0_3] : memref<16x2xf32, #tpu.memory_space<smem>>
    %c4 = arith.constant 4 : index
    %c0_4 = arith.constant 0 : index
    %4 = memref.load %arg2[%c4, %c0_4] : memref<16x2xf32, #tpu.memory_space<smem>>
    %c5 = arith.constant 5 : index
    %c0_5 = arith.constant 0 : index
    %5 = memref.load %arg2[%c5, %c0_5] : memref<16x2xf32, #tpu.memory_space<smem>>
    %c6 = arith.constant 6 : index
    %c0_6 = arith.constant 0 : index
    %6 = memref.load %arg2[%c6, %c0_6] : memref<16x2xf32, #tpu.memory_space<smem>>
    %c7 = arith.constant 7 : index
    %c0_7 = arith.constant 0 : index
    %7 = memref.load %arg2[%c7, %c0_7] : memref<16x2xf32, #tpu.memory_space<smem>>
    %c8 = arith.constant 8 : index
    %c0_8 = arith.constant 0 : index
    %8 = memref.load %arg2[%c8, %c0_8] : memref<16x2xf32, #tpu.memory_space<smem>>
    %c9 = arith.constant 9 : index
    %c0_9 = arith.constant 0 : index
    %9 = memref.load %arg2[%c9, %c0_9] : memref<16x2xf32, #tpu.memory_space<smem>>
    %c10 = arith.constant 10 : index
    %c0_10 = arith.constant 0 : index
    %10 = memref.load %arg2[%c10, %c0_10] : memref<16x2xf32, #tpu.memory_space<smem>>
    %c11 = arith.constant 11 : index
    %c0_11 = arith.constant 0 : index
    %11 = memref.load %arg2[%c11, %c0_11] : memref<16x2xf32, #tpu.memory_space<smem>>
    %c12 = arith.constant 12 : index
    %c0_12 = arith.constant 0 : index
    %12 = memref.load %arg2[%c12, %c0_12] : memref<16x2xf32, #tpu.memory_space<smem>>
    %c13 = arith.constant 13 : index
    %c0_13 = arith.constant 0 : index
    %13 = memref.load %arg2[%c13, %c0_13] : memref<16x2xf32, #tpu.memory_space<smem>>
    %c14 = arith.constant 14 : index
    %c0_14 = arith.constant 0 : index
    %14 = memref.load %arg2[%c14, %c0_14] : memref<16x2xf32, #tpu.memory_space<smem>>
    %c15 = arith.constant 15 : index
    %c0_15 = arith.constant 0 : index
    %15 = memref.load %arg2[%c15, %c0_15] : memref<16x2xf32, #tpu.memory_space<smem>>
    %c0_16 = arith.constant 0 : index
    %c1_17 = arith.constant 1 : index
    %16 = memref.load %arg2[%c0_16, %c1_17] : memref<16x2xf32, #tpu.memory_space<smem>>
    %c1_18 = arith.constant 1 : index
    %c1_19 = arith.constant 1 : index
    %17 = memref.load %arg2[%c1_18, %c1_19] : memref<16x2xf32, #tpu.memory_space<smem>>
    %c2_20 = arith.constant 2 : index
    %c1_21 = arith.constant 1 : index
    %18 = memref.load %arg2[%c2_20, %c1_21] : memref<16x2xf32, #tpu.memory_space<smem>>
    %c3_22 = arith.constant 3 : index
    %c1_23 = arith.constant 1 : index
    %19 = memref.load %arg2[%c3_22, %c1_23] : memref<16x2xf32, #tpu.memory_space<smem>>
    %c4_24 = arith.constant 4 : index
    %c1_25 = arith.constant 1 : index
    %20 = memref.load %arg2[%c4_24, %c1_25] : memref<16x2xf32, #tpu.memory_space<smem>>
    %c5_26 = arith.constant 5 : index
    %c1_27 = arith.constant 1 : index
    %21 = memref.load %arg2[%c5_26, %c1_27] : memref<16x2xf32, #tpu.memory_space<smem>>
    %c6_28 = arith.constant 6 : index
    %c1_29 = arith.constant 1 : index
    %22 = memref.load %arg2[%c6_28, %c1_29] : memref<16x2xf32, #tpu.memory_space<smem>>
    %c7_30 = arith.constant 7 : index
    %c1_31 = arith.constant 1 : index
    %23 = memref.load %arg2[%c7_30, %c1_31] : memref<16x2xf32, #tpu.memory_space<smem>>
    %c8_32 = arith.constant 8 : index
    %c1_33 = arith.constant 1 : index
    %24 = memref.load %arg2[%c8_32, %c1_33] : memref<16x2xf32, #tpu.memory_space<smem>>
    %c9_34 = arith.constant 9 : index
    %c1_35 = arith.constant 1 : index
    %25 = memref.load %arg2[%c9_34, %c1_35] : memref<16x2xf32, #tpu.memory_space<smem>>
    %c10_36 = arith.constant 10 : index
    %c1_37 = arith.constant 1 : index
    %26 = memref.load %arg2[%c10_36, %c1_37] : memref<16x2xf32, #tpu.memory_space<smem>>
    %c11_38 = arith.constant 11 : index
    %c1_39 = arith.constant 1 : index
    %27 = memref.load %arg2[%c11_38, %c1_39] : memref<16x2xf32, #tpu.memory_space<smem>>
    %c12_40 = arith.constant 12 : index
    %c1_41 = arith.constant 1 : index
    %28 = memref.load %arg2[%c12_40, %c1_41] : memref<16x2xf32, #tpu.memory_space<smem>>
    %c13_42 = arith.constant 13 : index
    %c1_43 = arith.constant 1 : index
    %29 = memref.load %arg2[%c13_42, %c1_43] : memref<16x2xf32, #tpu.memory_space<smem>>
    %c14_44 = arith.constant 14 : index
    %c1_45 = arith.constant 1 : index
    %30 = memref.load %arg2[%c14_44, %c1_45] : memref<16x2xf32, #tpu.memory_space<smem>>
    %c15_46 = arith.constant 15 : index
    %c1_47 = arith.constant 1 : index
    %31 = memref.load %arg2[%c15_46, %c1_47] : memref<16x2xf32, #tpu.memory_space<smem>>
    %c0_48 = arith.constant 0 : index
    %32 = memref.load %arg3[%c0_48] : memref<16xf32, #tpu.memory_space<smem>>
    %c1_49 = arith.constant 1 : index
    %33 = memref.load %arg3[%c1_49] : memref<16xf32, #tpu.memory_space<smem>>
    %c2_50 = arith.constant 2 : index
    %34 = memref.load %arg3[%c2_50] : memref<16xf32, #tpu.memory_space<smem>>
    %c3_51 = arith.constant 3 : index
    %35 = memref.load %arg3[%c3_51] : memref<16xf32, #tpu.memory_space<smem>>
    %c4_52 = arith.constant 4 : index
    %36 = memref.load %arg3[%c4_52] : memref<16xf32, #tpu.memory_space<smem>>
    %c5_53 = arith.constant 5 : index
    %37 = memref.load %arg3[%c5_53] : memref<16xf32, #tpu.memory_space<smem>>
    %c6_54 = arith.constant 6 : index
    %38 = memref.load %arg3[%c6_54] : memref<16xf32, #tpu.memory_space<smem>>
    %c7_55 = arith.constant 7 : index
    %39 = memref.load %arg3[%c7_55] : memref<16xf32, #tpu.memory_space<smem>>
    %c8_56 = arith.constant 8 : index
    %40 = memref.load %arg3[%c8_56] : memref<16xf32, #tpu.memory_space<smem>>
    %c9_57 = arith.constant 9 : index
    %41 = memref.load %arg3[%c9_57] : memref<16xf32, #tpu.memory_space<smem>>
    %c10_58 = arith.constant 10 : index
    %42 = memref.load %arg3[%c10_58] : memref<16xf32, #tpu.memory_space<smem>>
    %c11_59 = arith.constant 11 : index
    %43 = memref.load %arg3[%c11_59] : memref<16xf32, #tpu.memory_space<smem>>
    %c12_60 = arith.constant 12 : index
    %44 = memref.load %arg3[%c12_60] : memref<16xf32, #tpu.memory_space<smem>>
    %c13_61 = arith.constant 13 : index
    %45 = memref.load %arg3[%c13_61] : memref<16xf32, #tpu.memory_space<smem>>
    %c14_62 = arith.constant 14 : index
    %46 = memref.load %arg3[%c14_62] : memref<16xf32, #tpu.memory_space<smem>>
    %c15_63 = arith.constant 15 : index
    %47 = memref.load %arg3[%c15_63] : memref<16xf32, #tpu.memory_space<smem>>
    %c0_64 = arith.constant 0 : index
    %c0_65 = arith.constant 0 : index
    %48 = memref.load %arg4[%c0_64, %c0_65] : memref<2x16xf32, #tpu.memory_space<smem>>
    %c0_66 = arith.constant 0 : index
    %c1_67 = arith.constant 1 : index
    %49 = memref.load %arg4[%c0_66, %c1_67] : memref<2x16xf32, #tpu.memory_space<smem>>
    %c0_68 = arith.constant 0 : index
    %c2_69 = arith.constant 2 : index
    %50 = memref.load %arg4[%c0_68, %c2_69] : memref<2x16xf32, #tpu.memory_space<smem>>
    %c0_70 = arith.constant 0 : index
    %c3_71 = arith.constant 3 : index
    %51 = memref.load %arg4[%c0_70, %c3_71] : memref<2x16xf32, #tpu.memory_space<smem>>
    %c0_72 = arith.constant 0 : index
    %c4_73 = arith.constant 4 : index
    %52 = memref.load %arg4[%c0_72, %c4_73] : memref<2x16xf32, #tpu.memory_space<smem>>
    %c0_74 = arith.constant 0 : index
    %c5_75 = arith.constant 5 : index
    %53 = memref.load %arg4[%c0_74, %c5_75] : memref<2x16xf32, #tpu.memory_space<smem>>
    %c0_76 = arith.constant 0 : index
    %c6_77 = arith.constant 6 : index
    %54 = memref.load %arg4[%c0_76, %c6_77] : memref<2x16xf32, #tpu.memory_space<smem>>
    %c0_78 = arith.constant 0 : index
    %c7_79 = arith.constant 7 : index
    %55 = memref.load %arg4[%c0_78, %c7_79] : memref<2x16xf32, #tpu.memory_space<smem>>
    %c0_80 = arith.constant 0 : index
    %c8_81 = arith.constant 8 : index
    %56 = memref.load %arg4[%c0_80, %c8_81] : memref<2x16xf32, #tpu.memory_space<smem>>
    %c0_82 = arith.constant 0 : index
    %c9_83 = arith.constant 9 : index
    %57 = memref.load %arg4[%c0_82, %c9_83] : memref<2x16xf32, #tpu.memory_space<smem>>
    %c0_84 = arith.constant 0 : index
    %c10_85 = arith.constant 10 : index
    %58 = memref.load %arg4[%c0_84, %c10_85] : memref<2x16xf32, #tpu.memory_space<smem>>
    %c0_86 = arith.constant 0 : index
    %c11_87 = arith.constant 11 : index
    %59 = memref.load %arg4[%c0_86, %c11_87] : memref<2x16xf32, #tpu.memory_space<smem>>
    %c0_88 = arith.constant 0 : index
    %c12_89 = arith.constant 12 : index
    %60 = memref.load %arg4[%c0_88, %c12_89] : memref<2x16xf32, #tpu.memory_space<smem>>
    %c0_90 = arith.constant 0 : index
    %c13_91 = arith.constant 13 : index
    %61 = memref.load %arg4[%c0_90, %c13_91] : memref<2x16xf32, #tpu.memory_space<smem>>
    %c0_92 = arith.constant 0 : index
    %c14_93 = arith.constant 14 : index
    %62 = memref.load %arg4[%c0_92, %c14_93] : memref<2x16xf32, #tpu.memory_space<smem>>
    %c0_94 = arith.constant 0 : index
    %c15_95 = arith.constant 15 : index
    %63 = memref.load %arg4[%c0_94, %c15_95] : memref<2x16xf32, #tpu.memory_space<smem>>
    %c1_96 = arith.constant 1 : index
    %c0_97 = arith.constant 0 : index
    %64 = memref.load %arg4[%c1_96, %c0_97] : memref<2x16xf32, #tpu.memory_space<smem>>
    %c1_98 = arith.constant 1 : index
    %c1_99 = arith.constant 1 : index
    %65 = memref.load %arg4[%c1_98, %c1_99] : memref<2x16xf32, #tpu.memory_space<smem>>
    %c1_100 = arith.constant 1 : index
    %c2_101 = arith.constant 2 : index
    %66 = memref.load %arg4[%c1_100, %c2_101] : memref<2x16xf32, #tpu.memory_space<smem>>
    %c1_102 = arith.constant 1 : index
    %c3_103 = arith.constant 3 : index
    %67 = memref.load %arg4[%c1_102, %c3_103] : memref<2x16xf32, #tpu.memory_space<smem>>
    %c1_104 = arith.constant 1 : index
    %c4_105 = arith.constant 4 : index
    %68 = memref.load %arg4[%c1_104, %c4_105] : memref<2x16xf32, #tpu.memory_space<smem>>
    %c1_106 = arith.constant 1 : index
    %c5_107 = arith.constant 5 : index
    %69 = memref.load %arg4[%c1_106, %c5_107] : memref<2x16xf32, #tpu.memory_space<smem>>
    %c1_108 = arith.constant 1 : index
    %c6_109 = arith.constant 6 : index
    %70 = memref.load %arg4[%c1_108, %c6_109] : memref<2x16xf32, #tpu.memory_space<smem>>
    %c1_110 = arith.constant 1 : index
    %c7_111 = arith.constant 7 : index
    %71 = memref.load %arg4[%c1_110, %c7_111] : memref<2x16xf32, #tpu.memory_space<smem>>
    %c1_112 = arith.constant 1 : index
    %c8_113 = arith.constant 8 : index
    %72 = memref.load %arg4[%c1_112, %c8_113] : memref<2x16xf32, #tpu.memory_space<smem>>
    %c1_114 = arith.constant 1 : index
    %c9_115 = arith.constant 9 : index
    %73 = memref.load %arg4[%c1_114, %c9_115] : memref<2x16xf32, #tpu.memory_space<smem>>
    %c1_116 = arith.constant 1 : index
    %c10_117 = arith.constant 10 : index
    %74 = memref.load %arg4[%c1_116, %c10_117] : memref<2x16xf32, #tpu.memory_space<smem>>
    %c1_118 = arith.constant 1 : index
    %c11_119 = arith.constant 11 : index
    %75 = memref.load %arg4[%c1_118, %c11_119] : memref<2x16xf32, #tpu.memory_space<smem>>
    %c1_120 = arith.constant 1 : index
    %c12_121 = arith.constant 12 : index
    %76 = memref.load %arg4[%c1_120, %c12_121] : memref<2x16xf32, #tpu.memory_space<smem>>
    %c1_122 = arith.constant 1 : index
    %c13_123 = arith.constant 13 : index
    %77 = memref.load %arg4[%c1_122, %c13_123] : memref<2x16xf32, #tpu.memory_space<smem>>
    %c1_124 = arith.constant 1 : index
    %c14_125 = arith.constant 14 : index
    %78 = memref.load %arg4[%c1_124, %c14_125] : memref<2x16xf32, #tpu.memory_space<smem>>
    %c1_126 = arith.constant 1 : index
    %c15_127 = arith.constant 15 : index
    %79 = memref.load %arg4[%c1_126, %c15_127] : memref<2x16xf32, #tpu.memory_space<smem>>
    %c0_128 = arith.constant 0 : index
    %80 = memref.load %arg5[%c0_128] : memref<2xf32, #tpu.memory_space<smem>>
    %c1_129 = arith.constant 1 : index
    %81 = memref.load %arg5[%c1_129] : memref<2xf32, #tpu.memory_space<smem>>
    %c0_130 = arith.constant 0 : index
    %c0_131 = arith.constant 0 : index
    %c0_132 = arith.constant 0 : index
    %82 = vector.load %arg1[%c0_130, %c0_131, %c0_132] : memref<2x1x128xf32, #tpu.memory_space<vmem>>, vector<1x1x128xf32>
    %83 = vector.shape_cast %82 : vector<1x1x128xf32> to vector<1x128xf32>
    %c1_133 = arith.constant 1 : index
    %c0_134 = arith.constant 0 : index
    %c0_135 = arith.constant 0 : index
    %84 = vector.load %arg1[%c1_133, %c0_134, %c0_135] : memref<2x1x128xf32, #tpu.memory_space<vmem>>, vector<1x1x128xf32>
    %85 = vector.shape_cast %84 : vector<1x1x128xf32> to vector<1x128xf32>
    %86 = vector.broadcast %80 : f32 to vector<1x128xf32>
    %87 = vector.broadcast %81 : f32 to vector<1x128xf32>
    %88 = vector.broadcast %0 : f32 to vector<1x128xf32>
    %89 = arith.mulf %88, %83 : vector<1x128xf32>
    %90 = vector.broadcast %16 : f32 to vector<1x128xf32>
    %91 = arith.mulf %90, %85 : vector<1x128xf32>
    %92 = arith.addf %89, %91 : vector<1x128xf32>
    %93 = vector.broadcast %32 : f32 to vector<1x128xf32>
    %94 = arith.addf %92, %93 : vector<1x128xf32>
    %cst = arith.constant 0.000000e+00 : f32
    %95 = vector.broadcast %cst : f32 to vector<1x128xf32>
    %96 = arith.maximumf %94, %95 : vector<1x128xf32>
    %97 = vector.broadcast %48 : f32 to vector<1x128xf32>
    %98 = arith.mulf %97, %96 : vector<1x128xf32>
    %99 = arith.addf %86, %98 : vector<1x128xf32>
    %100 = vector.broadcast %64 : f32 to vector<1x128xf32>
    %101 = arith.mulf %100, %96 : vector<1x128xf32>
    %102 = arith.addf %87, %101 : vector<1x128xf32>
    %103 = vector.broadcast %1 : f32 to vector<1x128xf32>
    %104 = arith.mulf %103, %83 : vector<1x128xf32>
    %105 = vector.broadcast %17 : f32 to vector<1x128xf32>
    %106 = arith.mulf %105, %85 : vector<1x128xf32>
    %107 = arith.addf %104, %106 : vector<1x128xf32>
    %108 = vector.broadcast %33 : f32 to vector<1x128xf32>
    %109 = arith.addf %107, %108 : vector<1x128xf32>
    %cst_136 = arith.constant 0.000000e+00 : f32
    %110 = vector.broadcast %cst_136 : f32 to vector<1x128xf32>
    %111 = arith.maximumf %109, %110 : vector<1x128xf32>
    %112 = vector.broadcast %49 : f32 to vector<1x128xf32>
    %113 = arith.mulf %112, %111 : vector<1x128xf32>
    %114 = arith.addf %99, %113 : vector<1x128xf32>
    %115 = vector.broadcast %65 : f32 to vector<1x128xf32>
    %116 = arith.mulf %115, %111 : vector<1x128xf32>
    %117 = arith.addf %102, %116 : vector<1x128xf32>
    %118 = vector.broadcast %2 : f32 to vector<1x128xf32>
    %119 = arith.mulf %118, %83 : vector<1x128xf32>
    %120 = vector.broadcast %18 : f32 to vector<1x128xf32>
    %121 = arith.mulf %120, %85 : vector<1x128xf32>
    %122 = arith.addf %119, %121 : vector<1x128xf32>
    %123 = vector.broadcast %34 : f32 to vector<1x128xf32>
    %124 = arith.addf %122, %123 : vector<1x128xf32>
    %cst_137 = arith.constant 0.000000e+00 : f32
    %125 = vector.broadcast %cst_137 : f32 to vector<1x128xf32>
    %126 = arith.maximumf %124, %125 : vector<1x128xf32>
    %127 = vector.broadcast %50 : f32 to vector<1x128xf32>
    %128 = arith.mulf %127, %126 : vector<1x128xf32>
    %129 = arith.addf %114, %128 : vector<1x128xf32>
    %130 = vector.broadcast %66 : f32 to vector<1x128xf32>
    %131 = arith.mulf %130, %126 : vector<1x128xf32>
    %132 = arith.addf %117, %131 : vector<1x128xf32>
    %133 = vector.broadcast %3 : f32 to vector<1x128xf32>
    %134 = arith.mulf %133, %83 : vector<1x128xf32>
    %135 = vector.broadcast %19 : f32 to vector<1x128xf32>
    %136 = arith.mulf %135, %85 : vector<1x128xf32>
    %137 = arith.addf %134, %136 : vector<1x128xf32>
    %138 = vector.broadcast %35 : f32 to vector<1x128xf32>
    %139 = arith.addf %137, %138 : vector<1x128xf32>
    %cst_138 = arith.constant 0.000000e+00 : f32
    %140 = vector.broadcast %cst_138 : f32 to vector<1x128xf32>
    %141 = arith.maximumf %139, %140 : vector<1x128xf32>
    %142 = vector.broadcast %51 : f32 to vector<1x128xf32>
    %143 = arith.mulf %142, %141 : vector<1x128xf32>
    %144 = arith.addf %129, %143 : vector<1x128xf32>
    %145 = vector.broadcast %67 : f32 to vector<1x128xf32>
    %146 = arith.mulf %145, %141 : vector<1x128xf32>
    %147 = arith.addf %132, %146 : vector<1x128xf32>
    %148 = vector.broadcast %4 : f32 to vector<1x128xf32>
    %149 = arith.mulf %148, %83 : vector<1x128xf32>
    %150 = vector.broadcast %20 : f32 to vector<1x128xf32>
    %151 = arith.mulf %150, %85 : vector<1x128xf32>
    %152 = arith.addf %149, %151 : vector<1x128xf32>
    %153 = vector.broadcast %36 : f32 to vector<1x128xf32>
    %154 = arith.addf %152, %153 : vector<1x128xf32>
    %cst_139 = arith.constant 0.000000e+00 : f32
    %155 = vector.broadcast %cst_139 : f32 to vector<1x128xf32>
    %156 = arith.maximumf %154, %155 : vector<1x128xf32>
    %157 = vector.broadcast %52 : f32 to vector<1x128xf32>
    %158 = arith.mulf %157, %156 : vector<1x128xf32>
    %159 = arith.addf %144, %158 : vector<1x128xf32>
    %160 = vector.broadcast %68 : f32 to vector<1x128xf32>
    %161 = arith.mulf %160, %156 : vector<1x128xf32>
    %162 = arith.addf %147, %161 : vector<1x128xf32>
    %163 = vector.broadcast %5 : f32 to vector<1x128xf32>
    %164 = arith.mulf %163, %83 : vector<1x128xf32>
    %165 = vector.broadcast %21 : f32 to vector<1x128xf32>
    %166 = arith.mulf %165, %85 : vector<1x128xf32>
    %167 = arith.addf %164, %166 : vector<1x128xf32>
    %168 = vector.broadcast %37 : f32 to vector<1x128xf32>
    %169 = arith.addf %167, %168 : vector<1x128xf32>
    %cst_140 = arith.constant 0.000000e+00 : f32
    %170 = vector.broadcast %cst_140 : f32 to vector<1x128xf32>
    %171 = arith.maximumf %169, %170 : vector<1x128xf32>
    %172 = vector.broadcast %53 : f32 to vector<1x128xf32>
    %173 = arith.mulf %172, %171 : vector<1x128xf32>
    %174 = arith.addf %159, %173 : vector<1x128xf32>
    %175 = vector.broadcast %69 : f32 to vector<1x128xf32>
    %176 = arith.mulf %175, %171 : vector<1x128xf32>
    %177 = arith.addf %162, %176 : vector<1x128xf32>
    %178 = vector.broadcast %6 : f32 to vector<1x128xf32>
    %179 = arith.mulf %178, %83 : vector<1x128xf32>
    %180 = vector.broadcast %22 : f32 to vector<1x128xf32>
    %181 = arith.mulf %180, %85 : vector<1x128xf32>
    %182 = arith.addf %179, %181 : vector<1x128xf32>
    %183 = vector.broadcast %38 : f32 to vector<1x128xf32>
    %184 = arith.addf %182, %183 : vector<1x128xf32>
    %cst_141 = arith.constant 0.000000e+00 : f32
    %185 = vector.broadcast %cst_141 : f32 to vector<1x128xf32>
    %186 = arith.maximumf %184, %185 : vector<1x128xf32>
    %187 = vector.broadcast %54 : f32 to vector<1x128xf32>
    %188 = arith.mulf %187, %186 : vector<1x128xf32>
    %189 = arith.addf %174, %188 : vector<1x128xf32>
    %190 = vector.broadcast %70 : f32 to vector<1x128xf32>
    %191 = arith.mulf %190, %186 : vector<1x128xf32>
    %192 = arith.addf %177, %191 : vector<1x128xf32>
    %193 = vector.broadcast %7 : f32 to vector<1x128xf32>
    %194 = arith.mulf %193, %83 : vector<1x128xf32>
    %195 = vector.broadcast %23 : f32 to vector<1x128xf32>
    %196 = arith.mulf %195, %85 : vector<1x128xf32>
    %197 = arith.addf %194, %196 : vector<1x128xf32>
    %198 = vector.broadcast %39 : f32 to vector<1x128xf32>
    %199 = arith.addf %197, %198 : vector<1x128xf32>
    %cst_142 = arith.constant 0.000000e+00 : f32
    %200 = vector.broadcast %cst_142 : f32 to vector<1x128xf32>
    %201 = arith.maximumf %199, %200 : vector<1x128xf32>
    %202 = vector.broadcast %55 : f32 to vector<1x128xf32>
    %203 = arith.mulf %202, %201 : vector<1x128xf32>
    %204 = arith.addf %189, %203 : vector<1x128xf32>
    %205 = vector.broadcast %71 : f32 to vector<1x128xf32>
    %206 = arith.mulf %205, %201 : vector<1x128xf32>
    %207 = arith.addf %192, %206 : vector<1x128xf32>
    %208 = vector.broadcast %8 : f32 to vector<1x128xf32>
    %209 = arith.mulf %208, %83 : vector<1x128xf32>
    %210 = vector.broadcast %24 : f32 to vector<1x128xf32>
    %211 = arith.mulf %210, %85 : vector<1x128xf32>
    %212 = arith.addf %209, %211 : vector<1x128xf32>
    %213 = vector.broadcast %40 : f32 to vector<1x128xf32>
    %214 = arith.addf %212, %213 : vector<1x128xf32>
    %cst_143 = arith.constant 0.000000e+00 : f32
    %215 = vector.broadcast %cst_143 : f32 to vector<1x128xf32>
    %216 = arith.maximumf %214, %215 : vector<1x128xf32>
    %217 = vector.broadcast %56 : f32 to vector<1x128xf32>
    %218 = arith.mulf %217, %216 : vector<1x128xf32>
    %219 = arith.addf %204, %218 : vector<1x128xf32>
    %220 = vector.broadcast %72 : f32 to vector<1x128xf32>
    %221 = arith.mulf %220, %216 : vector<1x128xf32>
    %222 = arith.addf %207, %221 : vector<1x128xf32>
    %223 = vector.broadcast %9 : f32 to vector<1x128xf32>
    %224 = arith.mulf %223, %83 : vector<1x128xf32>
    %225 = vector.broadcast %25 : f32 to vector<1x128xf32>
    %226 = arith.mulf %225, %85 : vector<1x128xf32>
    %227 = arith.addf %224, %226 : vector<1x128xf32>
    %228 = vector.broadcast %41 : f32 to vector<1x128xf32>
    %229 = arith.addf %227, %228 : vector<1x128xf32>
    %cst_144 = arith.constant 0.000000e+00 : f32
    %230 = vector.broadcast %cst_144 : f32 to vector<1x128xf32>
    %231 = arith.maximumf %229, %230 : vector<1x128xf32>
    %232 = vector.broadcast %57 : f32 to vector<1x128xf32>
    %233 = arith.mulf %232, %231 : vector<1x128xf32>
    %234 = arith.addf %219, %233 : vector<1x128xf32>
    %235 = vector.broadcast %73 : f32 to vector<1x128xf32>
    %236 = arith.mulf %235, %231 : vector<1x128xf32>
    %237 = arith.addf %222, %236 : vector<1x128xf32>
    %238 = vector.broadcast %10 : f32 to vector<1x128xf32>
    %239 = arith.mulf %238, %83 : vector<1x128xf32>
    %240 = vector.broadcast %26 : f32 to vector<1x128xf32>
    %241 = arith.mulf %240, %85 : vector<1x128xf32>
    %242 = arith.addf %239, %241 : vector<1x128xf32>
    %243 = vector.broadcast %42 : f32 to vector<1x128xf32>
    %244 = arith.addf %242, %243 : vector<1x128xf32>
    %cst_145 = arith.constant 0.000000e+00 : f32
    %245 = vector.broadcast %cst_145 : f32 to vector<1x128xf32>
    %246 = arith.maximumf %244, %245 : vector<1x128xf32>
    %247 = vector.broadcast %58 : f32 to vector<1x128xf32>
    %248 = arith.mulf %247, %246 : vector<1x128xf32>
    %249 = arith.addf %234, %248 : vector<1x128xf32>
    %250 = vector.broadcast %74 : f32 to vector<1x128xf32>
    %251 = arith.mulf %250, %246 : vector<1x128xf32>
    %252 = arith.addf %237, %251 : vector<1x128xf32>
    %253 = vector.broadcast %11 : f32 to vector<1x128xf32>
    %254 = arith.mulf %253, %83 : vector<1x128xf32>
    %255 = vector.broadcast %27 : f32 to vector<1x128xf32>
    %256 = arith.mulf %255, %85 : vector<1x128xf32>
    %257 = arith.addf %254, %256 : vector<1x128xf32>
    %258 = vector.broadcast %43 : f32 to vector<1x128xf32>
    %259 = arith.addf %257, %258 : vector<1x128xf32>
    %cst_146 = arith.constant 0.000000e+00 : f32
    %260 = vector.broadcast %cst_146 : f32 to vector<1x128xf32>
    %261 = arith.maximumf %259, %260 : vector<1x128xf32>
    %262 = vector.broadcast %59 : f32 to vector<1x128xf32>
    %263 = arith.mulf %262, %261 : vector<1x128xf32>
    %264 = arith.addf %249, %263 : vector<1x128xf32>
    %265 = vector.broadcast %75 : f32 to vector<1x128xf32>
    %266 = arith.mulf %265, %261 : vector<1x128xf32>
    %267 = arith.addf %252, %266 : vector<1x128xf32>
    %268 = vector.broadcast %12 : f32 to vector<1x128xf32>
    %269 = arith.mulf %268, %83 : vector<1x128xf32>
    %270 = vector.broadcast %28 : f32 to vector<1x128xf32>
    %271 = arith.mulf %270, %85 : vector<1x128xf32>
    %272 = arith.addf %269, %271 : vector<1x128xf32>
    %273 = vector.broadcast %44 : f32 to vector<1x128xf32>
    %274 = arith.addf %272, %273 : vector<1x128xf32>
    %cst_147 = arith.constant 0.000000e+00 : f32
    %275 = vector.broadcast %cst_147 : f32 to vector<1x128xf32>
    %276 = arith.maximumf %274, %275 : vector<1x128xf32>
    %277 = vector.broadcast %60 : f32 to vector<1x128xf32>
    %278 = arith.mulf %277, %276 : vector<1x128xf32>
    %279 = arith.addf %264, %278 : vector<1x128xf32>
    %280 = vector.broadcast %76 : f32 to vector<1x128xf32>
    %281 = arith.mulf %280, %276 : vector<1x128xf32>
    %282 = arith.addf %267, %281 : vector<1x128xf32>
    %283 = vector.broadcast %13 : f32 to vector<1x128xf32>
    %284 = arith.mulf %283, %83 : vector<1x128xf32>
    %285 = vector.broadcast %29 : f32 to vector<1x128xf32>
    %286 = arith.mulf %285, %85 : vector<1x128xf32>
    %287 = arith.addf %284, %286 : vector<1x128xf32>
    %288 = vector.broadcast %45 : f32 to vector<1x128xf32>
    %289 = arith.addf %287, %288 : vector<1x128xf32>
    %cst_148 = arith.constant 0.000000e+00 : f32
    %290 = vector.broadcast %cst_148 : f32 to vector<1x128xf32>
    %291 = arith.maximumf %289, %290 : vector<1x128xf32>
    %292 = vector.broadcast %61 : f32 to vector<1x128xf32>
    %293 = arith.mulf %292, %291 : vector<1x128xf32>
    %294 = arith.addf %279, %293 : vector<1x128xf32>
    %295 = vector.broadcast %77 : f32 to vector<1x128xf32>
    %296 = arith.mulf %295, %291 : vector<1x128xf32>
    %297 = arith.addf %282, %296 : vector<1x128xf32>
    %298 = vector.broadcast %14 : f32 to vector<1x128xf32>
    %299 = arith.mulf %298, %83 : vector<1x128xf32>
    %300 = vector.broadcast %30 : f32 to vector<1x128xf32>
    %301 = arith.mulf %300, %85 : vector<1x128xf32>
    %302 = arith.addf %299, %301 : vector<1x128xf32>
    %303 = vector.broadcast %46 : f32 to vector<1x128xf32>
    %304 = arith.addf %302, %303 : vector<1x128xf32>
    %cst_149 = arith.constant 0.000000e+00 : f32
    %305 = vector.broadcast %cst_149 : f32 to vector<1x128xf32>
    %306 = arith.maximumf %304, %305 : vector<1x128xf32>
    %307 = vector.broadcast %62 : f32 to vector<1x128xf32>
    %308 = arith.mulf %307, %306 : vector<1x128xf32>
    %309 = arith.addf %294, %308 : vector<1x128xf32>
    %310 = vector.broadcast %78 : f32 to vector<1x128xf32>
    %311 = arith.mulf %310, %306 : vector<1x128xf32>
    %312 = arith.addf %297, %311 : vector<1x128xf32>
    %313 = vector.broadcast %15 : f32 to vector<1x128xf32>
    %314 = arith.mulf %313, %83 : vector<1x128xf32>
    %315 = vector.broadcast %31 : f32 to vector<1x128xf32>
    %316 = arith.mulf %315, %85 : vector<1x128xf32>
    %317 = arith.addf %314, %316 : vector<1x128xf32>
    %318 = vector.broadcast %47 : f32 to vector<1x128xf32>
    %319 = arith.addf %317, %318 : vector<1x128xf32>
    %cst_150 = arith.constant 0.000000e+00 : f32
    %320 = vector.broadcast %cst_150 : f32 to vector<1x128xf32>
    %321 = arith.maximumf %319, %320 : vector<1x128xf32>
    %322 = vector.broadcast %63 : f32 to vector<1x128xf32>
    %323 = arith.mulf %322, %321 : vector<1x128xf32>
    %324 = arith.addf %309, %323 : vector<1x128xf32>
    %325 = vector.broadcast %79 : f32 to vector<1x128xf32>
    %326 = arith.mulf %325, %321 : vector<1x128xf32>
    %327 = arith.addf %312, %326 : vector<1x128xf32>
    %c0_151 = arith.constant 0 : index
    %c0_152 = arith.constant 0 : index
    %c0_153 = arith.constant 0 : index
    %328 = vector.load %arg6[%c0_151, %c0_152, %c0_153] : memref<2x1x128xf32, #tpu.memory_space<vmem>>, vector<1x1x128xf32>
    %329 = vector.shape_cast %328 : vector<1x1x128xf32> to vector<1x128xf32>
    %330 = vector.shape_cast %324 : vector<1x128xf32> to vector<1x1x128xf32>
    tpu.vector_store %arg6[%c0_151, %c0_152, %c0_153], %330 {strides = array<i32>} : memref<2x1x128xf32, #tpu.memory_space<vmem>>, vector<1x1x128xf32>,
    %c1_154 = arith.constant 1 : index
    %c0_155 = arith.constant 0 : index
    %c0_156 = arith.constant 0 : index
    %331 = vector.load %arg6[%c1_154, %c0_155, %c0_156] : memref<2x1x128xf32, #tpu.memory_space<vmem>>, vector<1x1x128xf32>
    %332 = vector.shape_cast %331 : vector<1x1x128xf32> to vector<1x128xf32>
    %333 = vector.shape_cast %327 : vector<1x128xf32> to vector<1x1x128xf32>
    tpu.vector_store %arg6[%c1_154, %c0_155, %c0_156], %333 {strides = array<i32>} : memref<2x1x128xf32, #tpu.memory_space<vmem>>, vector<1x1x128xf32>,
    return
  }
  func.func @transform_0(%arg0: i32) -> (i32, i32, i32) {
    %c0_i32 = arith.constant 0 : i32
    %c0_i32_0 = arith.constant 0 : i32
    %c0_i32_1 = arith.constant 0 : i32
    return %c0_i32, %arg0, %c0_i32_0 : i32, i32, i32
  }
  func.func @transform_1(%arg0: i32) -> (i32, i32) {
    %c0_i32 = arith.constant 0 : i32
    %c0_i32_0 = arith.constant 0 : i32
    %c0_i32_1 = arith.constant 0 : i32
    return %c0_i32, %c0_i32_0 : i32, i32
  }
  func.func @transform_2(%arg0: i32) -> i32 {
    %c0_i32 = arith.constant 0 : i32
    %c0_i32_0 = arith.constant 0 : i32
    return %c0_i32 : i32
  }
  func.func @transform_3(%arg0: i32) -> (i32, i32) {
    %c0_i32 = arith.constant 0 : i32
    %c0_i32_0 = arith.constant 0 : i32
    %c0_i32_1 = arith.constant 0 : i32
    return %c0_i32, %c0_i32_0 : i32, i32
  }
  func.func @transform_4(%arg0: i32) -> i32 {
    %c0_i32 = arith.constant 0 : i32
    %c0_i32_0 = arith.constant 0 : i32
    return %c0_i32 : i32
  }
  func.func @transform_5(%arg0: i32) -> (i32, i32, i32) {
    %c0_i32 = arith.constant 0 : i32
    %c0_i32_0 = arith.constant 0 : i32
    %c0_i32_1 = arith.constant 0 : i32
    return %c0_i32, %arg0, %c0_i32_0 : i32, i32, i32
  }
}

</mosaic_0001>

<bundles_post_ra>
// kernel: simplenet_forward.1
= control target key start
LH: loop header
LB: loop body
LE: loop exit
PB: predicated region body
PF: predicated region fallthrough
CT: control target
= control target key end

     0   :  { %10 = vsyncpa [#allocation3], 0  ;;  %s972_s0 = inlined_call_operand.vmem [shape: f32[2,1,128], index: 0, kind: input, shape index: {}]   ;;  %s973_s1 = inlined_call_operand.vmem [shape: f32[16,2], index: 1, kind: input, shape index: {}]   ;;  %s974_s2 = inlined_call_operand.vmem [shape: f32[16], index: 2, kind: input, shape index: {}]   ;;  %s975_s3 = inlined_call_operand.vmem [shape: f32[2,16], index: 3, kind: input, shape index: {}]   ;;  %s976_s4 = inlined_call_operand.vmem [shape: f32[2], index: 4, kind: input, shape index: {}]   ;;  %s977_s5 = inlined_call_operand.vmem [shape: f32[2,1,128], index: 5, kind: output, shape index: {}]  }
   0x1   :  { %11 = vsyncpa [#allocation5], 0  ;;  %s33_s20 = sshll.u32 %s974_s2, 4  ;;  %s34_s20 = int_to_ptr.vmem [resolvable:$true] %s33_s20 }
   0x2   :  { %12 = vsyncpa [#allocation8], 0  ;;  %s20_s23 = sshll.u32 %s973_s1, 4  ;;  %s477_s24 = scalar_lea.vmem %s34_s20, 16  ;;  %s21_s23 = int_to_ptr.vmem [resolvable:$true] %s20_s23 }
   0x3   :  { %p478_p0 = scmp.ne.s32.totalorder %s34_s20, %s477_s24  ;;  %p482_p1 = scmp.lt.s32.totalorder %s34_s20, %s34_s20 }
   0x4   :  { %p483_p2 = scmp.lt.s32.totalorder %s477_s24, %s477_s24 }
   0x6   :  { %p484_p3 = por %p483_p2, %p482_p1 }
   0x8   :  { %p485_p4 = pnand %p484_p3, %p478_p0 }
   0xa   :  { %488 = shalt.err (!%p485_p4)
}
   0xb   :  { %s531_s25 = smov [#allocation4]   ;;  %s489_s26 = scalar_lea.vmem %s21_s23, 256 }
   0xc   :  { %36 = dma.vmem_to_smem %s34_s20, 16, %s531_s25, [#allocation5]  }
   0xd   :  { %p490_p5 = scmp.ne.s32.totalorder %s21_s23, %s489_s26  ;;  %p494_p6 = scmp.lt.s32.totalorder %s21_s23, %s21_s23 }
   0xe   :  { %p495_p7 = scmp.lt.s32.totalorder %s489_s26, %s489_s26 }
  0x10   :  { %p496_p8 = por %p495_p7, %p494_p6 }
  0x12   :  { %p497_p9 = pnand %p496_p8, %p490_p5 }
  0x14   :  { %500 = shalt.err (!%p497_p9)
}
  0x15   :  { %s532_s2 = smov [#allocation2]   ;;  %s533_s27 = smov 128  }
  0x16   :  { %s534_s1 = smov 8   ;;  %s43_s30 = sshll.u32 %s975_s3, 4  ;;  %s44_s30 = int_to_ptr.vmem [resolvable:$true] %s43_s30 }
  0x17   :  { %26 = dma.vmem_to_smem %s21_s23, 256, %s532_s2, [#allocation3], %s533_s27, %s533_s27, %s534_s1  }
  0x18   :  { %s53_s8 = sshll.u32 %s976_s4, 4  ;;  %s501_s9 = scalar_lea.vmem %s44_s30, 32  ;;  %s54_s8 = int_to_ptr.vmem [resolvable:$true] %s53_s8 }
  0x19   :  { %p502_p10 = scmp.ne.s32.totalorder %s44_s30, %s501_s9  ;;  %p506_p11 = scmp.lt.s32.totalorder %s44_s30, %s44_s30 }
  0x1a   :  { %p507_p12 = scmp.lt.s32.totalorder %s501_s9, %s501_s9 }
  0x1c   :  { %p508_p13 = por %p507_p12, %p506_p11 }
  0x1e   :  { %p509_p0 = pnand %p508_p13, %p502_p10 }
  0x20   :  { %512 = shalt.err (!%p509_p0)
}
  0x21   :  { %s535_s10 = smov [#allocation6]   ;;  %s513_s11 = scalar_lea.vmem %s54_s8, 16 }
  0x22   :  { %46 = dma.vmem_to_smem %s44_s30, 32, %s535_s10, [#allocation5]  }
  0x23   :  { %p514_p1 = scmp.ne.s32.totalorder %s54_s8, %s513_s11  ;;  %p518_p2 = scmp.lt.s32.totalorder %s54_s8, %s54_s8 }
  0x24   :  { %p519_p3 = scmp.lt.s32.totalorder %s513_s11, %s513_s11 }
  0x26   :  { %p520_p4 = por %p519_p3, %p518_p2 }
  0x28   :  { %p521_p5 = pnand %p520_p4, %p514_p1 }
  0x2a   :  { %524 = shalt.err (!%p521_p5)
}
  0x2b   :  { %s536_s3 = smov [#allocation7]  }
  0x2c   :  { %56 = dma.vmem_to_smem %s54_s8, 16, %s536_s3, [#allocation8]  }
  0x2d   :  { %525 = dma.done.wait [#allocation3], 256  }
  0x2e   :  { %526 = vsyncadd [#allocation3], 4294967040 }
  0x2f   :  { %527 = dma.done.wait [#allocation5], 48  }
  0x30   :  { %528 = vsyncadd [#allocation5], 4294967248 }
  0x31   :  { %529 = dma.done.wait [#allocation8], 16  }
  0x32   :  { %530 = vsyncadd [#allocation8], 4294967280 }
  0x33   :  { %69 = sfence }
  0x34   :  { %s579_s4 = sld [smem:[#allocation2]]  ;;  %s599_s21 = sld [smem:[#allocation2 + $0x1]]  ;;  %v620_v0 = vld [vmem:[%s972_s0] sm:$0x1]  ;;  %v660_v16 = vld [vmem:[%s972_s0 + $0x1] sm:$0x1] }
  0x35   :  { %s581_s12 = sld [smem:[#allocation2 + $0x80]]  ;;  %s601_s22 = sld [smem:[#allocation2 + $0x81]] }
  0x36   :  { %s583_s13 = sld [smem:[#allocation2 + $0x100]]  ;;  %s603_s23 = sld [smem:[#allocation2 + $0x101]] }
  0x37   :  { %s585_s14 = sld [smem:[#allocation2 + $0x180]]  ;;  %s605_s24 = sld [smem:[#allocation2 + $0x181]] }
  0x38   :  { %s587_s15 = sld [smem:[#allocation2 + $0x200]]  ;;  %s607_s25 = sld [smem:[#allocation2 + $0x201]] }
  0x39   :  { %s589_s16 = sld [smem:[#allocation2 + $0x280]]  ;;  %s609_s26 = sld [smem:[#allocation2 + $0x281]] }
  0x3a   :  { %s591_s17 = sld [smem:[#allocation2 + $0x300]]  ;;  %s615_s1 = sld [smem:[#allocation2 + $0x301]]  ;;  %v157_v1 = vstv %s579_s4  ;;  %v159_v17 = vstv %s599_s21 }
  0x3b   :  { %s593_s18 = sld [smem:[#allocation2 + $0x380]]  ;;  %v171_v2 = vstv %s581_s12  ;;  %s627_s6 = sld [smem:[#allocation2 + $0x381]]  ;;  %v158_v8 = vmul.f32 %v157_v1, %v620_v0  ;;  %v173_v18 = vstv %s601_s22  ;;  %v160_v29 = vmul.f32 %v660_v16, %v159_v17 }
  0x3c   :  { %s595_s19 = sld [smem:[#allocation2 + $0x400]]  ;;  %v185_v3 = vstv %s583_s13  ;;  %s639_s10 = sld [smem:[#allocation2 + $0x401]]  ;;  %v172_v9 = vmul.f32 %v171_v2, %v620_v0  ;;  %v187_v19 = vstv %s603_s23  ;;  %v174_v30 = vmul.f32 %v660_v16, %v173_v18 }
  0x3d   :  { %s597_s20 = sld [smem:[#allocation2 + $0x480]]  ;;  %v199_v4 = vstv %s585_s14  ;;  %v186_v10 = vmul.f32 %v185_v3, %v620_v0  ;;  %s645_s11 = sld [smem:[#allocation2 + $0x481]]  ;;  %v201_v21 = vstv %s605_s24  ;;  %v188_v31 = vmul.f32 %v660_v16, %v187_v19 }
  0x3e   :  { %s611_s2 = sld [smem:[#allocation2 + $0x500]]  ;;  %v213_v5 = vstv %s587_s15  ;;  %s647_s3 = sld [smem:[#allocation2 + $0x501]]  ;;  %v200_v12 = vmul.f32 %v199_v4, %v620_v0  ;;  %v215_v22 = vstv %s607_s25  ;;  %v202_v33 = vmul.f32 %v660_v16, %v201_v21 }
  0x3f   :  { %s613_s27 = sld [smem:[#allocation2 + $0x580]]  ;;  %v227_v6 = vstv %s589_s16  ;;  %v214_v13 = vmul.f32 %v213_v5, %v620_v0  ;;  %s655_s12 = sld [smem:[#allocation4 + $0x1]]  ;;  %v229_v23 = vstv %s609_s26  ;;  %v216_v34 = vmul.f32 %v660_v16, %v215_v22 }
  0x40   :  { %s625_s30 = sld [smem:[#allocation2 + $0x600]]  ;;  %v241_v7 = vstv %s591_s17  ;;  %v228_v14 = vmul.f32 %v227_v6, %v620_v0  ;;  %s666_s15 = sld [smem:[#allocation4 + $0x2]]  ;;  %v243_v32 = vstv %s615_s1  ;;  %v230_v35 = vmul.f32 %v660_v16, %v229_v23 }
  0x41   :  { %s632_s7 = sld [smem:[#allocation2 + $0x680]]  ;;  %v255_v11 = vstv %s593_s18  ;;  %v242_v20 = vmul.f32 %v241_v7, %v620_v0  ;;  %s668_s16 = sld [smem:[#allocation4 + $0x3]]  ;;  %v257_v36 = vstv %s627_s6  ;;  %v244_v41 = vmul.f32 %v660_v16, %v243_v32 }
  0x42   :  { %s634_s8 = sld [smem:[#allocation2 + $0x700]]  ;;  %v269_v15 = vstv %s595_s19  ;;  %v256_v24 = vmul.f32 %v255_v11, %v620_v0  ;;  %s674_s17 = sld [smem:[#allocation4 + $0x4]]  ;;  %v161_v45 = vadd.f32 %v160_v29, %v158_v8  ;;  %v175_v46 = vadd.f32 %v174_v30, %v172_v9 }
  0x43   :  { %s637_s9 = sld [smem:[#allocation2 + $0x780]]  ;;  %s676_s0 = sld [smem:[#allocation4 + $0x5]]  ;;  %v679_v25 = vmul.f32 %v269_v15, %v620_v0  ;;  %v283_v26 = vstv %s597_s20  ;;  %v189_v47 = vadd.f32 %v188_v31, %v186_v10  ;;  %v258_v48 = vmul.f32 %v660_v16, %v257_v36 }
  0x44   :  { %s653_s4 = sld [smem:[#allocation4]]  ;;  %v297_v27 = vstv %s611_s2  ;;  %s684_s18 = sld [smem:[#allocation2 + $0x581]]  ;;  %v699_v37 = vmul.f32 %v283_v26, %v620_v0  ;;  %v203_v49 = vadd.f32 %v202_v33, %v200_v12  ;;  %v217_v50 = vadd.f32 %v216_v34, %v214_v13 }
  0x45   :  { %v311_v28 = vstv %s613_s27  ;;  %s686_s19 = sld [smem:[#allocation4 + $0x6]]  ;;  %s692_s21 = sld [smem:[#allocation4 + $0x7]]  ;;  %v702_v38 = vmul.f32 %v297_v27, %v620_v0  ;;  %v231_v51 = vadd.f32 %v230_v35, %v228_v14  ;;  %v271_v52 = vstv %s639_s10 }
  0x46   :  { %v705_v39 = vmul.f32 %v311_v28, %v620_v0  ;;  %v325_v40 = vstv %s625_s30  ;;  %s713_s20 = sld [smem:[#allocation4 + $0x8]]  ;;  %s716_s22 = sld [smem:[#allocation4 + $0x9]]  ;;  %v176_v54 = vstv %s655_s12  ;;  %v190_v55 = vstv %s666_s15 }
  0x47   :  { %v339_v42 = vstv %s632_s7  ;;  %s718_s23 = sld [smem:[#allocation4 + $0xa]]  ;;  %v285_v56 = vstv %s645_s11  ;;  %s724_s24 = sld [smem:[#allocation6]]  ;;  %v204_v57 = vstv %s668_s16  ;;  %v245_v60 = vadd.f32 %v244_v41, %v242_v20 }
  0x48   :  { %v353_v43 = vstv %s634_s8  ;;  %s726_s25 = sld [smem:[#allocation6 + $0x1]]  ;;  %v218_v58 = vstv %s674_s17  ;;  %s731_s26 = sld [smem:[#allocation6 + $0x2]]  ;;  %v259_v62 = vadd.f32 %v258_v48, %v256_v24  ;;  %v299_v63 = vstv %s647_s3 }
  0x49   :  { %v367_v44 = vstv %s637_s9  ;;  %v232_v59 = vstv %s676_s0  ;;  %s733_s2 = sld [smem:[#allocation6 + $0x3]]  ;;  %s738_s27 = sld [smem:[#allocation6 + $0x4]]  ;;  %v742_v3 = vadd.f32 %v176_v54, %v175_v46  ;;  %v744_v4 = vadd.f32 %v190_v55, %v189_v47 }
  0x4a   :  { %v162_v53 = vstv %s653_s4  ;;  %v313_v1 = vstv %s684_s18  ;;  %s740_s1 = sld [smem:[#allocation6 + $0x80]]  ;;  %s747_s28 = sld [smem:[#allocation6 + $0x5]]  ;;  %v751_v6 = vadd.f32 %v204_v57, %v203_v49  ;;  %v753_v7 = vadd.f32 %v218_v58, %v217_v50 }
  0x4b   :  { %v246_v61 = vstv %s686_s19  ;;  %v163_v2 = vadd.f32 %v162_v53, %v161_v45  ;;  %v260_v5 = vstv %s692_s21  ;;  %s749_s29 = sld [smem:[#allocation6 + $0x6]]  ;;  %v755_v8 = vadd.f32 %v232_v59, %v231_v51  ;;  %s758_s30 = sld [smem:[#allocation6 + $0x7]] }
  0x4c   :  { %v272_v9 = vmul.f32 %v660_v16, %v271_v52  ;;  %s760_s6 = sld [smem:[#allocation6 + $0x81]]  ;;  %v762_v10 = vadd.f32 %v246_v61, %v245_v60  ;;  %v286_v11 = vmul.f32 %v660_v16, %v285_v56  ;;  %v766_v12 = vmul.f32 %v325_v40, %v620_v0  ;;  %s782_s8 = sld [smem:[#allocation6 + $0x82]] }
  0x4d   :  { %v769_v13 = vmul.f32 %v339_v42, %v620_v0  ;;  %s771_s7 = sld [smem:[#allocation2 + $0x601]]  ;;  %v773_v14 = vadd.f32 %v260_v5, %v259_v62  ;;  %v300_v15 = vmul.f32 %v660_v16, %v299_v63  ;;  %v777_v17 = vmul.f32 %v353_v43, %v620_v0  ;;  %s789_s9 = sld [smem:[#allocation6 + $0x8]] }
  0x4e   :  { %v780_v18 = vmul.f32 %v367_v44, %v620_v0  ;;  %v164_v19 = vmax.f32 %v163_v2, 0.0  ;;  %v178_v20 = vmax.f32 %v742_v3, 0.0  ;;  %v192_v21 = vmax.f32 %v744_v4, 0.0  ;;  %s795_s10 = sld [smem:[#allocation6 + $0x9]]  ;;  %s797_s11 = sld [smem:[#allocation6 + $0x83]] }
  0x4f   :  { %v787_v22 = vmul.f32 %v660_v16, %v313_v1  ;;  %v206_v23 = vmax.f32 %v751_v6, 0.0  ;;  %v220_v0 = vmax.f32 %v753_v7, 0.0  ;;  %v234_v24 = vmax.f32 %v755_v8, 0.0  ;;  %s803_s3 = sld [smem:[#allocation6 + $0xa]]  ;;  %s805_s4 = sld [smem:[#allocation6 + $0x84]] }
  0x50   :  { %v273_v26 = vadd.f32 %v272_v9, %v679_v25  ;;  %v248_v27 = vmax.f32 %v762_v10, 0.0  ;;  %v274_v28 = vstv %s713_s20  ;;  %v287_v29 = vadd.f32 %v286_v11, %v699_v37  ;;  %s811_s12 = sld [smem:[#allocation7]]  ;;  %s813_s13 = sld [smem:[#allocation7 + $0x1]] }
  0x51   :  { %v288_v30 = vstv %s716_s22  ;;  %v165_v25 = vstv %s724_s24  ;;  %v262_v31 = vmax.f32 %v773_v14, 0.0  ;;  %v301_v32 = vadd.f32 %v300_v15, %v702_v38  ;;  %s819_s14 = sld [smem:[#allocation2 + $0x681]]  ;;  %s826_s15 = sld [smem:[#allocation6 + $0x85]] }
  0x52   :  { %v302_v33 = vstv %s718_s23  ;;  %v168_v34 = vstv %s740_s1  ;;  %v179_v35 = vstv %s726_s25  ;;  %v193_v36 = vstv %s731_s26  ;;  %s832_s16 = sld [smem:[#allocation2 + $0x701]]  ;;  %s834_s17 = sld [smem:[#allocation6 + $0x86]] }
  0x53   :  { %v207_v37 = vstv %s733_s2  ;;  %v221_v40 = vstv %s738_s27  ;;  %v235_v41 = vstv %s747_s28  ;;  %v249_v42 = vstv %s749_s29  ;;  %s838_s0 = sld [smem:[#allocation4 + $0xb]]  ;;  %s853_s19 = sld [smem:[#allocation6 + $0x87]] }
  0x54   :  { %v824_v43 = vadd.f32 %v274_v28, %v273_v26  ;;  %v166_v38 = vmul.f32 %v165_v25, %v164_v19  ;;  %v182_v44 = vstv %s760_s6  ;;  %v263_v45 = vstv %s758_s30  ;;  %s840_s18 = sld [smem:[#allocation6 + $0xb]]  ;;  %s861_s21 = sld [smem:[#allocation2 + $0x781]] }
  0x55   :  { %v830_v46 = vadd.f32 %v288_v30, %v287_v29  ;;  %v169_v47 = vmul.f32 %v168_v34, %v164_v19  ;;  %v180_v48 = vmul.f32 %v179_v35, %v178_v20  ;;  %v194_v49 = vmul.f32 %v193_v36, %v192_v21  ;;  %s863_s20 = sld [smem:[#allocation4 + $0xc]]  ;;  %s869_s22 = sld [smem:[#allocation6 + $0x88]] }
  0x56   :  { %v208_v50 = vmul.f32 %v207_v37, %v206_v23  ;;  %v196_v51 = vstv %s782_s8  ;;  %v222_v52 = vmul.f32 %v221_v40, %v220_v0  ;;  %v847_v53 = vmul.f32 %v235_v41, %v234_v24  ;;  %s872_s23 = sld [smem:[#allocation6 + $0x89]]  ;;  %s879_s24 = sld [smem:[#allocation4 + $0xd]] }
  0x57   :  { %v851_v54 = vmul.f32 %v249_v42, %v248_v27  ;;  %v183_v55 = vmul.f32 %v182_v44, %v178_v20  ;;  %v857_v56 = vmul.f32 %v263_v45, %v262_v31  ;;  %v276_v57 = vmax.f32 %v824_v43, 0.0  ;;  %s892_s25 = sld [smem:[#allocation6 + $0x8a]]  ;;  %s897_s26 = sld [smem:[#allocation4 + $0xe]] }
  0x58   :  { %v277_v58 = vstv %s789_s9  ;;  %v155_v59 = vstv %s811_s12  ;;  %v156_v60 = vstv %s813_s13  ;;  %v210_v61 = vstv %s797_s11  ;;  %s903_s2 = sld [smem:[#allocation6 + $0x8b]]  ;;  %s908_s27 = sld [smem:[#allocation4 + $0xf]] }
  0x59   :  { %v290_v62 = vmax.f32 %v830_v46, 0.0  ;;  %v167_v63 = vadd.f32 %v166_v38, %v155_v59  ;;  %v170_v1 = vadd.f32 %v169_v47, %v156_v60  ;;  %v197_v2 = vmul.f32 %v196_v51, %v192_v21  ;;  %s915_s1 = sld [smem:[#allocation6 + $0xc]]  ;;  %s925_s29 = sld [smem:[#allocation6 + $0xd]] }
  0x5a   :  { %v327_v3 = vstv %s771_s7  ;;  %v224_v4 = vstv %s805_s4  ;;  %v291_v5 = vstv %s795_s10  ;;  %v876_v9 = vadd.f32 %v302_v33, %v301_v32  ;;  %s919_s28 = sld [smem:[#allocation6 + $0x8c]]  ;;  %s930_s30 = sld [smem:[#allocation6 + $0x8d]] }
  0x5b   :  { %v305_v11 = vstv %s803_s3  ;;  %v181_v15 = vadd.f32 %v180_v48, %v167_v63  ;;  %v184_v19 = vadd.f32 %v183_v55, %v170_v1  ;;  %v211_v20 = vmul.f32 %v210_v61, %v206_v23  ;;  %s940_s6 = sld [smem:[#allocation6 + $0xe]]  ;;  %s950_s8 = sld [smem:[#allocation6 + $0xf]] }
  0x5c   :  { %v341_v21 = vstv %s819_s14  ;;  %v238_v26 = vstv %s826_s15  ;;  %v887_v28 = vmul.f32 %v277_v58, %v276_v57  ;;  %v315_v29 = vadd.f32 %v787_v22, %v705_v39  ;;  %s942_s7 = sld [smem:[#allocation6 + $0x8e]]  ;;  %s952_s9 = sld [smem:[#allocation6 + $0x8f]] }
  0x5d   :  { %v328_v30 = vmul.f32 %v660_v16, %v327_v3  ;;  %v195_v25 = vadd.f32 %v194_v49, %v181_v15  ;;  %v198_v32 = vadd.f32 %v197_v2, %v184_v19  ;;  %v225_v6 = vmul.f32 %v224_v4, %v220_v0 }
  0x5e   :  { %v252_v23 = vstv %s834_s17  ;;  %v316_v33 = vstv %s838_s0  ;;  %v319_v34 = vstv %s840_s18  ;;  %v342_v39 = vmul.f32 %v660_v16, %v341_v21 }
  0x5f   :  { %v355_v22 = vstv %s832_s16  ;;  %v209_v35 = vadd.f32 %v208_v50, %v195_v25  ;;  %v212_v36 = vadd.f32 %v211_v20, %v198_v32  ;;  %v239_v7 = vmul.f32 %v238_v26, %v234_v24 }
  0x60   :  { %v266_v37 = vstv %s853_s19  ;;  %v253_v0 = vmul.f32 %v252_v23, %v248_v27  ;;  %v329_v40 = vadd.f32 %v328_v30, %v766_v12  ;;  %v330_v41 = vstv %s863_s20 }
  0x61   :  { %v369_v42 = vstv %s861_s21  ;;  %v223_v38 = vadd.f32 %v222_v52, %v209_v35  ;;  %v226_v44 = vadd.f32 %v225_v6, %v212_v36  ;;  %v280_v45 = vstv %s869_s22 }
  0x62   :  { %v356_v47 = vmul.f32 %v660_v16, %v355_v22  ;;  %v267_v8 = vmul.f32 %v266_v37, %v262_v31  ;;  %v294_v10 = vstv %s872_s23  ;;  %v317_v24 = vadd.f32 %v316_v33, %v315_v29 }
  0x63   :  { %v343_v12 = vadd.f32 %v342_v39, %v769_v13  ;;  %v237_v27 = vadd.f32 %v847_v53, %v223_v38  ;;  %v240_v48 = vadd.f32 %v239_v7, %v226_v44  ;;  %v344_v49 = vstv %s879_s24 }
  0x64   :  { %v370_v50 = vmul.f32 %v660_v16, %v369_v42  ;;  %v281_v14 = vmul.f32 %v280_v45, %v276_v57  ;;  %v292_v31 = vmul.f32 %v291_v5, %v290_v62  ;;  %v304_v13 = vmax.f32 %v876_v9, 0.0 }
  0x65   :  { %v331_v51 = vadd.f32 %v330_v41, %v329_v40  ;;  %v251_v52 = vadd.f32 %v851_v54, %v237_v27  ;;  %v254_v53 = vadd.f32 %v253_v0, %v240_v48  ;;  %v308_v55 = vstv %s892_s25 }
  0x66   :  { %v357_v58 = vadd.f32 %v356_v47, %v777_v17  ;;  %v295_v16 = vmul.f32 %v294_v10, %v290_v62  ;;  %v318_v43 = vmax.f32 %v317_v24, 0.0  ;;  %v345_v57 = vadd.f32 %v344_v49, %v343_v12 }
  0x67   :  { %v358_v59 = vstv %s897_s26  ;;  %v265_v60 = vadd.f32 %v857_v56, %v251_v52  ;;  %v268_v54 = vadd.f32 %v267_v8, %v254_v53  ;;  %v322_v61 = vstv %s903_s2 }
  0x68   :  { %v371_v63 = vadd.f32 %v370_v50, %v780_v18  ;;  %v306_v17 = vmul.f32 %v305_v11, %v304_v13  ;;  %v309_v46 = vmul.f32 %v308_v55, %v304_v13  ;;  %v332_v62 = vmax.f32 %v331_v51, 0.0 }
  0x69   :  { %v372_v1 = vstv %s908_s27  ;;  %v279_v2 = vadd.f32 %v887_v28, %v265_v60  ;;  %v282_v3 = vadd.f32 %v281_v14, %v268_v54  ;;  %v333_v56 = vstv %s915_s1 }
  0x6a   :  { %v359_v4 = vadd.f32 %v358_v59, %v357_v58  ;;  %v320_v5 = vmul.f32 %v319_v34, %v318_v43  ;;  %v323_v18 = vmul.f32 %v322_v61, %v318_v43  ;;  %v336_v9 = vstv %s919_s28 }
  0x6b   :  { %v346_v15 = vmax.f32 %v345_v57, 0.0  ;;  %v293_v19 = vadd.f32 %v292_v31, %v279_v2  ;;  %v296_v20 = vadd.f32 %v295_v16, %v282_v3  ;;  %v347_v21 = vstv %s925_s29 }
  0x6c   :  { %v373_v11 = vadd.f32 %v372_v1, %v371_v63  ;;  %v334_v26 = vmul.f32 %v333_v56, %v332_v62  ;;  %v350_v29 = vstv %s930_s30  ;;  %v337_v28 = vmul.f32 %v336_v9, %v332_v62 }
  0x6d   :  { %v307_v30 = vadd.f32 %v306_v17, %v293_v19  ;;  %v310_v25 = vadd.f32 %v309_v46, %v296_v20  ;;  %v360_v32 = vmax.f32 %v359_v4, 0.0  ;;  %v348_v6 = vmul.f32 %v347_v21, %v346_v15 }
  0x6e   :  { %v361_v23 = vstv %s940_s6  ;;  %v364_v33 = vstv %s942_s7  ;;  %v351_v22 = vmul.f32 %v350_v29, %v346_v15  ;;  %v374_v35 = vmax.f32 %v373_v11, 0.0 }
  0x6f   :  { %v321_v34 = vadd.f32 %v320_v5, %v307_v30  ;;  %v324_v39 = vadd.f32 %v323_v18, %v310_v25  ;;  %v375_v36 = vstv %s950_s8  ;;  %v378_v7 = vstv %s952_s9 }
  0x70   :  { %v362_v40 = vmul.f32 %v361_v23, %v360_v32  ;;  %v365_v41 = vmul.f32 %v364_v33, %v360_v32  ;;  %v376_v44 = vmul.f32 %v375_v36, %v374_v35  ;;  %v379_v45 = vmul.f32 %v378_v7, %v374_v35 }
  0x71   :  { %v335_v37 = vadd.f32 %v334_v26, %v321_v34  ;;  %v338_v0 = vadd.f32 %v337_v28, %v324_v39 }
  0x73   :  { %v349_v42 = vadd.f32 %v348_v6, %v335_v37  ;;  %v352_v38 = vadd.f32 %v351_v22, %v338_v0 }
  0x75   :  { %v363_v47 = vadd.f32 %v362_v40, %v349_v42  ;;  %v366_v8 = vadd.f32 %v365_v41, %v352_v38 }
  0x77   :  { %v377_v10 = vadd.f32 %v376_v44, %v363_v47  ;;  %v380_v24 = vadd.f32 %v379_v45, %v366_v8 }
  0x79   :  { %381 = vst [vmem:[%s977_s5] sm:$0x1] %v377_v10  ;;  %470 = vst [vmem:[%s977_s5 + $0x1] sm:$0x1] %v380_v24 }
  0x7a   :  { %388 = vsyncpa [#allocation3], 1 }
  0x7b   :  { %389 = vsyncpa [#allocation5], 1 }
  0x7c   :  { %390 = vsyncpa [#allocation8], 1 }

</bundles_post_ra>
